<compile_context>
chip_gen: v5e
topology: v5e:2x2
jax: 0.10.0
libtpu: 0.0.40
codegen_flags: <defaults>
</compile_context>

<pallas_src>
import jax
import jax.numpy as jnp
from jax import lax
from jax.experimental import pallas as pl
from jax.experimental.pallas import tpu as pltpu

HIDDEN = 64
BN_EPS = 1e-5
SMALL_BATCH_FALLBACK = 1024   # below this, plain fused XLA beats the Pallas path


def _round_up(n, m):
    return ((n + m - 1) // m) * m


def _mlp_kernel(x_ref, w1_ref, b12_ref, w2_ref, wo_t_ref, bo_ref, o_ref):
    """One batch tile: x (TB, D_in) -> o (out_dim, TB), transposed & lane-dense."""
    wdt = w1_ref.dtype                 # streaming/compute dtype (f32 or bf16)
    x = x_ref[...]                                                 # [TB, D_in]

    # layer1 + ReLU   (BN1 already folded into layer2's weights/bias)
    h1 = jnp.dot(x, w1_ref[...], preferred_element_type=jnp.float32)
    h1 = jnp.maximum(h1 + b12_ref[0:1, :], 0.0).astype(wdt)       # [TB, 64]

    # layer2 (BN1-folded) + ReLU   (BN2 folded into layer_out)
    h2 = jnp.dot(h1, w2_ref[...], preferred_element_type=jnp.float32)
    h2 = jnp.maximum(h2 + b12_ref[1:2, :], 0.0).astype(wdt)       # [TB, 64]

    # dropout: identity (eval mode)

    # layer_out, computed transposed:  y_t[o, b] = sum_k Wout_t[o, k] * h2[b, k]
    # -> (out_dim, TB) output block: batch on lanes, unmasked lane-dense stores.
    y_t = lax.dot_general(wo_t_ref[...], h2,
                          dimension_numbers=(((1,), (1,)), ((), ())),
                          preferred_element_type=jnp.float32)      # [out_dim, TB]
    o_ref[...] = y_t + bo_ref[...]


def _folded_forward_jnp(x, w1, b12, w2, wo_t, bo):
    """Plain-jnp eval path using the same folded params (small-batch fallback)."""
    dt = w1.dtype
    h1 = jnp.maximum(jnp.dot(x.astype(dt), w1,
                             preferred_element_type=jnp.float32) + b12[0:1], 0.0)
    h2 = jnp.maximum(jnp.dot(h1.astype(dt), w2,
                             preferred_element_type=jnp.float32) + b12[1:2], 0.0)
    y = jnp.dot(h2.astype(dt), wo_t.T, preferred_element_type=jnp.float32) + bo.T
    return y


def nonspiking_forward(x, params, *, block_b=2048,
                       compute_dtype=jnp.float32, use_pallas=None):
    """x: [B, input_dim] float32.  params: dict from init_params()."""
    B, D = x.shape
    if use_pallas is None:
        use_pallas = B >= SMALL_BATCH_FALLBACK

    # Matmul operands in the streaming/compute dtype; biases stay f32.
    # (bf16 streaming only pays off if the cast fuses with x's producer or x is
    #  already bf16 upstream; weights are resident so their dtype barely matters.)
    w1 = params["w1"].astype(compute_dtype)
    w2 = params["w2"].astype(compute_dtype)
    wo_t = params["wo_t"].astype(compute_dtype)
    b12 = params["b12"]
    bo = params["bo"]
    out_dim = wo_t.shape[0]
    xs = x.astype(compute_dtype)

    if not use_pallas:
        return _folded_forward_jnp(xs, w1, b12, w2, wo_t, bo)

    # Only sub-vreg batches get padded (tiny copy); otherwise stream x as-is
    # and let Pallas handle the ragged last block (masked output writes).
    Bp = B
    if B < 128:
        Bp = 128
        xs = jnp.pad(xs, ((0, Bp - B), (0, 0)))

    # Batch tile: multiple of 128 (lane-dense transposed output block, aligned
    # x sublanes), capped at block_b, and capped at ~half the batch so the grid
    # has >= 2 steps whenever possible (v7x megacore sharding).
    TB = min(block_b, max(128, _round_up(pl.cdiv(Bp, 2), 128)))
    grid = (pl.cdiv(Bp, TB),)

    def resident(arr):
        # Weights/biases: constant index_map -> DMA'd once, stay in VMEM.
        # (pl.Buffered(1) here would drop the redundant second buffer; left at
        #  the default for compatibility — it is a negligible cost.)
        return pl.BlockSpec(arr.shape, lambda i: (0, 0))

    y_t = pl.pallas_call(
        _mlp_kernel,
        out_shape=jax.ShapeDtypeStruct((out_dim, Bp), jnp.float32),
        grid=grid,
        in_specs=[
            pl.BlockSpec((TB, D), lambda i: (i, 0)),   # x: streamed batch tiles
            resident(w1),
            resident(b12),                             # b1 & folded b2 packed: one DMA
            resident(w2),
            resident(wo_t),
            resident(bo),
        ],
        out_specs=pl.BlockSpec((out_dim, TB), lambda i: (0, i)),
        compiler_params=pltpu.CompilerParams(
            dimension_semantics=("parallel",)),        # batch tiles independent
    )(xs, w1, b12, w2, wo_t, bo)

    return y_t[:, :B].T                                # back to [B, out_dim]


def init_params(key, input_dim, output_dim=1):
    """Deterministic synthetic parameters; eval-mode BN folded into next layers."""
    ks = jax.random.split(key, 7)

    def uniform(k, shape, bound):
        return jax.random.uniform(k, shape, jnp.float32, -bound, bound)

    # nn.Linear-style init bounds (1/sqrt(fan_in)); stored as [in, out].
    w1 = uniform(ks[0], (input_dim, HIDDEN), 1.0 / jnp.sqrt(input_dim))
    b1 = uniform(ks[1], (1, HIDDEN), 1.0 / jnp.sqrt(input_dim))
    w2 = uniform(ks[2], (HIDDEN, HIDDEN), 1.0 / jnp.sqrt(HIDDEN))
    b2 = uniform(ks[3], (1, HIDDEN), 1.0 / jnp.sqrt(HIDDEN))
    wo = uniform(ks[4], (HIDDEN, output_dim), 1.0 / jnp.sqrt(HIDDEN))
    bo = uniform(ks[5], (1, output_dim), 1.0 / jnp.sqrt(HIDDEN))

    # BatchNorm1d affine + running stats (synthetic, deterministic),
    # expressed as per-feature scale & shift: BN(x) = x*scale + shift.
    def bn_fold(kg, kb, km, kv):
        gamma = 1.0 + 0.1 * jax.random.normal(kg, (1, HIDDEN), jnp.float32)
        beta = 0.1 * jax.random.normal(kb, (1, HIDDEN), jnp.float32)
        mean = 0.1 * jax.random.normal(km, (1, HIDDEN), jnp.float32)
        var = jnp.abs(1.0 + 0.1 * jax.random.normal(kv, (1, HIDDEN), jnp.float32))
        scale = gamma / jnp.sqrt(var + BN_EPS)
        shift = beta - mean * scale
        return scale, shift

    kbn = jax.random.split(ks[6], 8)
    s1, t1 = bn_fold(kbn[0], kbn[1], kbn[2], kbn[3])
    s2, t2 = bn_fold(kbn[4], kbn[5], kbn[6], kbn[7])

    # Exact eval-mode folding: BN1 -> layer2, BN2 -> layer_out.
    w2f = s1.reshape(HIDDEN, 1) * w2               # [64, 64]
    b2f = t1 @ w2 + b2                             # [1, 64]
    wof = s2.reshape(HIDDEN, 1) * wo               # [64, out_dim]
    bof = t2 @ wo + bo                             # [1, out_dim]

    return dict(
        w1=w1,
        b12=jnp.concatenate([b1, b2f], axis=0),    # [2, 64]: both biases, one ref
        w2=w2f,
        wo_t=wof.T,                                # [out_dim, 64] -> trans-B matmul
        bo=bof.reshape(output_dim, 1),             # [out_dim, 1]: broadcasts over lanes
        # Unfolded copies, only used by the pure-JAX reference self-test.
        raw=dict(w1=w1, b1=b1, w2=w2, b2=b2, wo=wo, bo=bo,
                 s1=s1, t1=t1, s2=s2, t2=t2),
    )


if __name__ == "__main__":
    key = jax.random.PRNGKey(0)
    k_x, k_p, k_x2 = jax.random.split(key, 3)

    input_dim, output_dim = 32, 1
    params = init_params(k_p, input_dim, output_dim)
    r = params["raw"]

    def ref(x):
        # Pure-JAX reference using the ORIGINAL (unfolded) eval-mode computation.
        h1 = jnp.maximum(x @ r["w1"] + r["b1"], 0.0) * r["s1"] + r["t1"]
        h2 = jnp.maximum(h1 @ r["w2"] + r["b2"], 0.0) * r["s2"] + r["t2"]
        return h2 @ r["wo"] + r["bo"]

    # 1) small-shape smoke test through the Pallas path (pads 8 -> 128 rows).
    x_small = jax.random.normal(k_x, (8, input_dim), jnp.float32)
    y = nonspiking_forward(x_small, params, use_pallas=True)
    jax.block_until_ready(y)
    assert y.shape == (8, output_dim)
    assert jnp.allclose(y, ref(x_small), atol=1e-4, rtol=1e-4), "small-batch mismatch"

    # 2) ragged batch (not a multiple of 128): exercises cdiv grid, >=2 grid
    #    steps (v7x megacore), and the masked last output block — no jnp.pad of x.
    x_rag = jax.random.normal(k_x2, (333, input_dim), jnp.float32)
    y_rag = nonspiking_forward(x_rag, params, use_pallas=True)
    jax.block_until_ready(y_rag)
    assert y_rag.shape == (333, output_dim)
    assert jnp.allclose(y_rag, ref(x_rag), atol=1e-4, rtol=1e-4), "ragged-batch mismatch"

    # 3) bf16 streaming variant (v5e/v6e HBM-byte saver); looser tolerance.
    y_bf = nonspiking_forward(x_rag, params, use_pallas=True,
                              compute_dtype=jnp.bfloat16)
    jax.block_until_ready(y_bf)
    assert jnp.allclose(y_bf, ref(x_rag), atol=5e-2, rtol=5e-2), "bf16-path mismatch"

    # 4) default dispatcher: small batch routes through the fused-XLA fallback.
    y_fb = nonspiking_forward(x_small, params)
    jax.block_until_ready(y_fb)
    assert jnp.allclose(y_fb, ref(x_small), atol=1e-4, rtol=1e-4), "fallback mismatch"

    print("KERNEL_OK")
</pallas_src>

<mosaic_0001>
module attributes {stable_mosaic.version = 11 : i64} {
  func.func @_mlp_kernel(%arg0: i32, %arg1: memref<128x32xf32, #tpu.memory_space<vmem>>, %arg2: memref<32x64xf32, #tpu.memory_space<vmem>>, %arg3: memref<2x64xf32, #tpu.memory_space<vmem>>, %arg4: memref<64x64xf32, #tpu.memory_space<vmem>>, %arg5: memref<1x64xf32, #tpu.memory_space<vmem>>, %arg6: memref<1x1xf32, #tpu.memory_space<vmem>>, %arg7: memref<1x128xf32, #tpu.memory_space<vmem>>) attributes {dimension_semantics = [#tpu.dimension_semantics<parallel>], iteration_bounds = array<i64: 1>, scalar_prefetch = 0 : i64, scratch_operands = 0 : i64, tpu.core_type = #tpu.core_type<tc>, window_params = [{transform_indices = @transform_0, window_bounds = array<i64: 128, 32>}, {pipeline_mode = #tpu.pipeline_mode<synchronous>, transform_indices = @transform_1, window_bounds = array<i64: 32, 64>}, {pipeline_mode = #tpu.pipeline_mode<synchronous>, transform_indices = @transform_2, window_bounds = array<i64: 2, 64>}, {pipeline_mode = #tpu.pipeline_mode<synchronous>, transform_indices = @transform_3, window_bounds = array<i64: 64, 64>}, {pipeline_mode = #tpu.pipeline_mode<synchronous>, transform_indices = @transform_4, window_bounds = array<i64: 1, 64>}, {pipeline_mode = #tpu.pipeline_mode<synchronous>, transform_indices = @transform_5, window_bounds = array<i64: 1, 1>}, {transform_indices = @transform_6, window_bounds = array<i64: 1, 128>}]} {
    %c0 = arith.constant 0 : index
    %c0_0 = arith.constant 0 : index
    %0 = vector.load %arg1[%c0, %c0_0] : memref<128x32xf32, #tpu.memory_space<vmem>>, vector<128x32xf32>
    %c0_1 = arith.constant 0 : index
    %c0_2 = arith.constant 0 : index
    %1 = vector.load %arg2[%c0_1, %c0_2] : memref<32x64xf32, #tpu.memory_space<vmem>>, vector<32x64xf32>
    %cst = arith.constant dense<0.000000e+00> : vector<128x64xf32>
    %2 = tpu.matmul %0, %1, %cst {dimension_numbers = #tpu.dot_dimension_numbers<[1], [0], [0], [1], [0, 0, 1, 1], [], []>} : vector<128x32xf32>, vector<32x64xf32>, vector<128x64xf32> -> vector<128x64xf32>
    %c0_3 = arith.constant 0 : index
    %c0_4 = arith.constant 0 : index
    %3 = vector.load %arg3[%c0_3, %c0_4] : memref<2x64xf32, #tpu.memory_space<vmem>>, vector<1x64xf32>
    %4 = vector.broadcast %3 : vector<1x64xf32> to vector<128x64xf32>
    %5 = arith.addf %2, %4 : vector<128x64xf32>
    %cst_5 = arith.constant 0.000000e+00 : f32
    %6 = vector.broadcast %cst_5 : f32 to vector<128x64xf32>
    %7 = arith.maximumf %5, %6 : vector<128x64xf32>
    %c0_6 = arith.constant 0 : index
    %c0_7 = arith.constant 0 : index
    %8 = vector.load %arg4[%c0_6, %c0_7] : memref<64x64xf32, #tpu.memory_space<vmem>>, vector<64x64xf32>
    %cst_8 = arith.constant dense<0.000000e+00> : vector<128x64xf32>
    %9 = tpu.matmul %7, %8, %cst_8 {dimension_numbers = #tpu.dot_dimension_numbers<[1], [0], [0], [1], [0, 0, 1, 1], [], []>} : vector<128x64xf32>, vector<64x64xf32>, vector<128x64xf32> -> vector<128x64xf32>
    %c1 = arith.constant 1 : index
    %c0_9 = arith.constant 0 : index
    %10 = vector.load %arg3[%c1, %c0_9] : memref<2x64xf32, #tpu.memory_space<vmem>>, vector<1x64xf32>
    %11 = vector.broadcast %10 : vector<1x64xf32> to vector<128x64xf32>
    %12 = arith.addf %9, %11 : vector<128x64xf32>
    %cst_10 = arith.constant 0.000000e+00 : f32
    %13 = vector.broadcast %cst_10 : f32 to vector<128x64xf32>
    %14 = arith.maximumf %12, %13 : vector<128x64xf32>
    %c0_11 = arith.constant 0 : index
    %c0_12 = arith.constant 0 : index
    %15 = vector.load %arg5[%c0_11, %c0_12] : memref<1x64xf32, #tpu.memory_space<vmem>>, vector<1x64xf32>
    %cst_13 = arith.constant dense<0.000000e+00> : vector<1x128xf32>
    %16 = tpu.matmul %15, %14, %cst_13 {dimension_numbers = #tpu.dot_dimension_numbers<[1], [1], [0], [0], [0, 0, 1, 0], [], []>} : vector<1x64xf32>, vector<128x64xf32>, vector<1x128xf32> -> vector<1x128xf32>
    %c0_14 = arith.constant 0 : index
    %c0_15 = arith.constant 0 : index
    %17 = vector.load %arg6[%c0_14, %c0_15] : memref<1x1xf32, #tpu.memory_space<vmem>>, vector<1x1xf32>
    %18 = vector.broadcast %17 : vector<1x1xf32> to vector<1x128xf32>
    %19 = arith.addf %16, %18 : vector<1x128xf32>
    %c0_16 = arith.constant 0 : index
    %c0_17 = arith.constant 0 : index
    %20 = vector.load %arg7[%c0_16, %c0_17] : memref<1x128xf32, #tpu.memory_space<vmem>>, vector<1x128xf32>
    tpu.vector_store %arg7[%c0_16, %c0_17], %19 {strides = array<i32>} : memref<1x128xf32, #tpu.memory_space<vmem>>, vector<1x128xf32>,
    return
  }
  func.func @transform_0(%arg0: i32) -> (i32, i32) {
    %c0_i32 = arith.constant 0 : i32
    %c0_i32_0 = arith.constant 0 : i32
    return %arg0, %c0_i32 : i32, i32
  }
  func.func @transform_1(%arg0: i32) -> (i32, i32) {
    %c0_i32 = arith.constant 0 : i32
    %c0_i32_0 = arith.constant 0 : i32
    %c0_i32_1 = arith.constant 0 : i32
    return %c0_i32, %c0_i32_0 : i32, i32
  }
  func.func @transform_2(%arg0: i32) -> (i32, i32) {
    %c0_i32 = arith.constant 0 : i32
    %c0_i32_0 = arith.constant 0 : i32
    %c0_i32_1 = arith.constant 0 : i32
    return %c0_i32, %c0_i32_0 : i32, i32
  }
  func.func @transform_3(%arg0: i32) -> (i32, i32) {
    %c0_i32 = arith.constant 0 : i32
    %c0_i32_0 = arith.constant 0 : i32
    %c0_i32_1 = arith.constant 0 : i32
    return %c0_i32, %c0_i32_0 : i32, i32
  }
  func.func @transform_4(%arg0: i32) -> (i32, i32) {
    %c0_i32 = arith.constant 0 : i32
    %c0_i32_0 = arith.constant 0 : i32
    %c0_i32_1 = arith.constant 0 : i32
    return %c0_i32, %c0_i32_0 : i32, i32
  }
  func.func @transform_5(%arg0: i32) -> (i32, i32) {
    %c0_i32 = arith.constant 0 : i32
    %c0_i32_0 = arith.constant 0 : i32
    %c0_i32_1 = arith.constant 0 : i32
    return %c0_i32, %c0_i32_0 : i32, i32
  }
  func.func @transform_6(%arg0: i32) -> (i32, i32) {
    %c0_i32 = arith.constant 0 : i32
    %c0_i32_0 = arith.constant 0 : i32
    return %c0_i32, %arg0 : i32, i32
  }
}

</mosaic_0001>

<bundles_post_ra>
// kernel: tpu_custom_call.1
= control target key start
LH: loop header
LB: loop body
LE: loop exit
PB: predicated region body
PF: predicated region fallthrough
CT: control target
= control target key end

     0   :  { %s712_s0 = inlined_call_operand.vmem [shape: f32[128,32], index: 0, kind: input, shape index: {}]   ;;  %s713_s1 = inlined_call_operand.vmem [shape: f32[32,64], index: 1, kind: input, shape index: {}]   ;;  %s714_s2 = inlined_call_operand.vmem [shape: f32[2,64], index: 2, kind: input, shape index: {}]   ;;  %s715_s3 = inlined_call_operand.vmem [shape: f32[64,64], index: 3, kind: input, shape index: {}]   ;;  %s716_s4 = inlined_call_operand.vmem [shape: f32[1,64], index: 4, kind: input, shape index: {}]   ;;  %s717_s5 = inlined_call_operand.<no memory space> [shape: f32[1,1], index: 5, kind: input, shape index: {}]   ;;  %s718_s6 = inlined_call_operand.hbm [shape: f32[1,128], index: 6, kind: output, shape index: {}]  }
   0x1   :  { %v11_v0 = vstv %s717_s5 }
   0x2   :  { %12 = vst [vmem:[#allocation2] sm:$0x1] %v11_v0 }
   0x3   :  { %v45_v1 = vld [vmem:[%s713_s1 + $0x18] sm:$0xff]  ;;  %v44_v2 = vld [vmem:[%s713_s1 + $0x10] sm:$0xff]  ;;  %v43_v3 = vld [vmem:[%s713_s1 + $0x8] sm:$0xff] }
   0x4   :  { %109 = vmatpush.msra.mxu0 %v45_v1  ;;  %463 = vmatpush.msra.mxu3 %v45_v1 }
   0x6   :  { %110 = vmatpush.msra.mxu0 %v44_v2  ;;  %464 = vmatpush.msra.mxu3 %v44_v2 }
   0x7   :  { %13 = vsyncpa [#allocation4], 0  ;;  %v42_v4 = vld [vmem:[%s713_s1] sm:$0xff]  ;;  %vm48_vm0 = vcmask 261120   ;;  %v27_v6 = vld [vmem:[%s712_s0 + $0x8] sm:$0xff]  ;;  %vm188_vm1 = vcmask 523264  }
   0x8   :  { %111 = vmatpush.msra.mxu0 %v43_v3  ;;  %v26_v5 = vld [vmem:[%s712_s0] sm:$0xff]  ;;  %465 = vmatpush.msra.mxu3 %v43_v3  ;;  %v28_v7 = vld [vmem:[%s712_s0 + $0x10] sm:$0xff]  ;;  %v29_v8 = vld [vmem:[%s712_s0 + $0x18] sm:$0xff]  ;;  %s507_s5 = smov [#allocation3]   ;;  %s405_s9 = sshll.u32 %s718_s6, 4  ;;  %s406_s9 = int_to_ptr.hbm [resolvable:$true] %s405_s9 }
   0x9   :  { %v30_v9 = vld [vmem:[%s712_s0 + $0x20] sm:$0xff]  ;;  %v31_v10 = vld [vmem:[%s712_s0 + $0x28] sm:$0xff]  ;;  %v32_v11 = vld [vmem:[%s712_s0 + $0x30] sm:$0xff]  ;;  %s403_s30 = sshll.u32 %s507_s5, 4  ;;  %s404_s30 = int_to_ptr.vmem [resolvable:$true] %s403_s30 }
   0xa   :  { %112 = vmatpush.msra.mxu0 %v42_v4  ;;  %466 = vmatpush.msra.mxu3 %v42_v4  ;;  %v37_v12 = vld [vmem:[%s712_s0 + $0x58] sm:$0xff]  ;;  %v184_v14 = vld [vmem:[%s715_s3 + $0x30] sm:$0xff]  ;;  %v183_v15 = vld [vmem:[%s715_s3 + $0x28] sm:$0xff] }
   0xb   :  { %414 = vmatmul.msk.f32.vlgmr.msra.gmra.mxu0 %vm48_vm0, %v26_v5  ;;  %425 = vmatmul.msk.f32.vlgmr.msra.gmra.mxu3 %vm48_vm0, %v37_v12  ;;  %v185_v13 = vld [vmem:[%s715_s3 + $0x38] sm:$0xff]  ;;  %v182_v17 = vld [vmem:[%s715_s3 + $0x20] sm:$0xff]  ;;  %v39_v21 = vld [vmem:[%s712_s0 + $0x68] sm:$0xff] }
   0xc   :  { %245 = vmatpush.msra.mxu1 %v185_v13  ;;  %467 = vmatpush.msrb.mxu3 %v185_v13  ;;  %v33_v16 = vld [vmem:[%s712_s0 + $0x38] sm:$0xff]  ;;  %v38_v18 = vld [vmem:[%s712_s0 + $0x60] sm:$0xff]  ;;  %v35_v22 = vld [vmem:[%s712_s0 + $0x48] sm:$0xff] }
   0xd   :  { %v181_v19 = vld [vmem:[%s715_s3 + $0x18] sm:$0xff]  ;;  %v34_v20 = vld [vmem:[%s712_s0 + $0x40] sm:$0xff]  ;;  %v40_v23 = vld [vmem:[%s712_s0 + $0x70] sm:$0xff] }
   0xe   :  { %246 = vmatpush.msra.mxu1 %v184_v14  ;;  %468 = vmatpush.msrb.mxu3 %v184_v14  ;;  %v36_v24 = vld [vmem:[%s712_s0 + $0x50] sm:$0xff]  ;;  %v41_v25 = vld [vmem:[%s712_s0 + $0x78] sm:$0xff]  ;;  %v179_v27 = vld [vmem:[%s715_s3 + $0x8] sm:$0xff] }
   0xf   :  { %v180_v26 = vld [vmem:[%s715_s3 + $0x10] sm:$0xff]  ;;  %v178_v28 = vld [vmem:[%s715_s3] sm:$0xff] }
  0x10   :  { %247 = vmatpush.msra.mxu1 %v183_v15  ;;  %469 = vmatpush.msrb.mxu3 %v183_v15  ;;  %v649_v29 = vld [vmem:[%s714_s2] ss:$0 sm:$0xff] }
  0x12   :  { %248 = vmatpush.msra.mxu1 %v182_v17  ;;  %470 = vmatpush.msrb.mxu3 %v182_v17 }
  0x13   :  { %415 = vmatmul.msk.f32.gmra.mxu0 %vm48_vm0, %v27_v6  ;;  %426 = vmatmul.msk.f32.gmra.mxu3 %vm48_vm0, %v38_v18 }
  0x14   :  { %249 = vmatpush.msra.mxu1 %v181_v19  ;;  %471 = vmatpush.msrb.mxu3 %v181_v19 }
  0x16   :  { %250 = vmatpush.msra.mxu1 %v180_v26  ;;  %472 = vmatpush.msrb.mxu3 %v180_v26  ;;  %v479_v26 = vld [vmem:[%s714_s2 + $0x1] ss:$0 sm:$0xff] }
  0x18   :  { %251 = vmatpush.msra.mxu1 %v179_v27  ;;  %473 = vmatpush.msrb.mxu3 %v179_v27 }
  0x1a   :  { %252 = vmatpush.msra.mxu1 %v178_v28  ;;  %474 = vmatpush.msrb.mxu3 %v178_v28 }
  0x1b   :  { %416 = vmatmul.msk.f32.gmra.mxu0 %vm48_vm0, %v28_v7  ;;  %427 = vmatmul.msk.f32.gmra.mxu3 %vm48_vm0, %v39_v21 }
  0x23   :  { %417 = vmatmul.msk.f32.gmra.mxu0 %vm48_vm0, %v29_v8  ;;  %428 = vmatmul.msk.f32.gmra.mxu3 %vm48_vm0, %v40_v23 }
  0x2b   :  { %418 = vmatmul.msk.f32.gmra.mxu0 %vm48_vm0, %v30_v9  ;;  %429 = vmatmul.msk.f32.gmra.mxu3 %vm48_vm0, %v41_v25 }
  0x33   :  { %419 = vmatmul.msk.f32.gmra.mxu0 %vm48_vm0, %v31_v10 }
  0x3b   :  { %420 = vmatmul.msk.f32.gmra.mxu0 %vm48_vm0, %v32_v11 }
  0x43   :  { %421 = vmatmul.msk.f32.gmra.mxu0 %vm48_vm0, %v33_v16 }
  0x4b   :  { %422 = vmatmul.msk.f32.gmra.mxu0 %vm48_vm0, %v34_v20 }
  0x53   :  { %423 = vmatmul.msk.f32.gmra.mxu0 %vm48_vm0, %v35_v22 }
  0x5b   :  { %424 = vmatmul.msk.f32.gmra.mxu0 %vm48_vm0, %v36_v24 }
  0x88   :  { %v114_v30 = vpop.f32.mrf.mxu0 }
  0x89   :  { %v115_v31 = vadd.f32 %v649_v29, %v114_v30 }
  0x8b   :  { %v162_v32 = vmax.f32 %v115_v31, 0.0 }
  0x8d   :  { %430 = vmatmul.msk.f32.vlgmr.msra.gmra.mxu1 %vm188_vm1, %v162_v32 }
  0x8e   :  { %v147_v59 = vpop.f32.mrf.mxu3 }
  0x8f   :  { %v148_v1 = vadd.f32 %v649_v29, %v147_v59 }
  0x90   :  { %v117_v33 = vpop.f32.mrf.mxu0 }
  0x91   :  { %v118_v34 = vadd.f32 %v649_v29, %v117_v33  ;;  %v173_v2 = vmax.f32 %v148_v1, 0.0  ;;  %v318_v1 = vld [vmem:[%s716_s4] sm:$0x1] }
  0x93   :  { %v163_v35 = vmax.f32 %v118_v34, 0.0 }
  0x95   :  { %431 = vmatmul.msk.f32.gmra.mxu1 %vm188_vm1, %v163_v35 }
  0x96   :  { %v150_v0 = vpop.f32.mrf.mxu3 }
  0x97   :  { %v151_v3 = vadd.f32 %v649_v29, %v150_v0 }
  0x98   :  { %v120_v36 = vpop.f32.mrf.mxu0 }
  0x99   :  { %v121_v37 = vadd.f32 %v649_v29, %v120_v36  ;;  %v174_v5 = vmax.f32 %v151_v3, 0.0 }
  0x9b   :  { %v164_v38 = vmax.f32 %v121_v37, 0.0 }
  0x9d   :  { %432 = vmatmul.msk.f32.gmra.mxu1 %vm188_vm1, %v164_v38 }
  0x9e   :  { %v153_v4 = vpop.f32.mrf.mxu3 }
  0x9f   :  { %v154_v6 = vadd.f32 %v649_v29, %v153_v4 }
  0xa0   :  { %v123_v39 = vpop.f32.mrf.mxu0 }
  0xa1   :  { %v124_v40 = vadd.f32 %v649_v29, %v123_v39  ;;  %v175_v8 = vmax.f32 %v154_v6, 0.0 }
  0xa3   :  { %v165_v41 = vmax.f32 %v124_v40, 0.0 }
  0xa5   :  { %433 = vmatmul.msk.f32.gmra.mxu1 %vm188_vm1, %v165_v41 }
  0xa6   :  { %v156_v7 = vpop.f32.mrf.mxu3 }
  0xa7   :  { %v157_v9 = vadd.f32 %v649_v29, %v156_v7 }
  0xa8   :  { %v126_v42 = vpop.f32.mrf.mxu0 }
  0xa9   :  { %v127_v43 = vadd.f32 %v649_v29, %v126_v42  ;;  %v176_v10 = vmax.f32 %v157_v9, 0.0 }
  0xab   :  { %v166_v44 = vmax.f32 %v127_v43, 0.0 }
  0xad   :  { %434 = vmatmul.msk.f32.gmra.mxu1 %vm188_vm1, %v166_v44 }
  0xae   :  { %v159_v11 = vpop.f32.mrf.mxu3 }
  0xaf   :  { %v160_v12 = vadd.f32 %v649_v29, %v159_v11 }
  0xb0   :  { %v129_v45 = vpop.f32.mrf.mxu0 }
  0xb1   :  { %v130_v46 = vadd.f32 %v649_v29, %v129_v45  ;;  %v177_v13 = vmax.f32 %v160_v12, 0.0 }
  0xb3   :  { %v167_v47 = vmax.f32 %v130_v46, 0.0 }
  0xb5   :  { %435 = vmatmul.msk.f32.gmra.mxu1 %vm188_vm1, %v167_v47 }
  0xb8   :  { %v132_v48 = vpop.f32.mrf.mxu0 }
  0xb9   :  { %v133_v49 = vadd.f32 %v649_v29, %v132_v48 }
  0xbb   :  { %v168_v50 = vmax.f32 %v133_v49, 0.0 }
  0xbd   :  { %436 = vmatmul.msk.f32.gmra.mxu1 %vm188_vm1, %v168_v50  ;;  %v319_v50 = vld [vmem:[#allocation2] sm:$0x1] }
  0xc0   :  { %v135_v51 = vpop.f32.mrf.mxu0 }
  0xc1   :  { %v136_v52 = vadd.f32 %v649_v29, %v135_v51  ;;  %v506_v51 = vmov 0  }
  0xc2   :  { %477 = vset.pattern.permute.xlu0 %v506_v51 }
  0xc3   :  { %v169_v53 = vmax.f32 %v136_v52, 0.0  ;;  %322 = vperm.xlu0 %477, %v319_v50  }
  0xc5   :  { %437 = vmatmul.msk.f32.gmra.mxu1 %vm188_vm1, %v169_v53 }
  0xc8   :  { %v138_v54 = vpop.f32.mrf.mxu0 }
  0xc9   :  { %v139_v55 = vadd.f32 %v649_v29, %v138_v54 }
  0xcb   :  { %v170_v56 = vmax.f32 %v139_v55, 0.0 }
  0xcd   :  { %438 = vmatmul.msk.f32.gmra.mxu1 %vm188_vm1, %v170_v56 }
  0xd0   :  { %v141_v57 = vpop.f32.mrf.mxu0 }
  0xd1   :  { %v142_v58 = vadd.f32 %v649_v29, %v141_v57 }
  0xd3   :  { %v171_v60 = vmax.f32 %v142_v58, 0.0 }
  0xd5   :  { %439 = vmatmul.msk.f32.gmra.mxu1 %vm188_vm1, %v171_v60 }
  0xd8   :  { %v144_v61 = vpop.f32.mrf.mxu0 }
  0xd9   :  { %v145_v62 = vadd.f32 %v649_v29, %v144_v61 }
  0xdb   :  { %v172_v63 = vmax.f32 %v145_v62, 0.0 }
  0xdd   :  { %440 = vmatmul.msk.f32.vlgmr.msrb.gmra.mxu3 %vm188_vm1, %v172_v63 }
  0xe5   :  { %441 = vmatmul.msk.f32.gmra.mxu3 %vm188_vm1, %v173_v2 }
  0xed   :  { %442 = vmatmul.msk.f32.gmra.mxu3 %vm188_vm1, %v174_v5 }
  0xf5   :  { %443 = vmatmul.msk.f32.gmra.mxu3 %vm188_vm1, %v175_v8 }
  0xfd   :  { %444 = vmatmul.msk.f32.gmra.mxu3 %vm188_vm1, %v176_v10 }
 0x105   :  { %445 = vmatmul.msk.f32.gmra.mxu3 %vm188_vm1, %v177_v13 }
 0x10a   :  { %v683_v14 = vpop.f32.mrf.mxu1 }
 0x10b   :  { %v255_v62 = vadd.f32 %v479_v26, %v683_v14 }
 0x10d   :  { %v302_v0 = vmax.f32 %v255_v62, 0.0 }
 0x112   :  { %v257_v15 = vpop.f32.mrf.mxu1 }
 0x113   :  { %v258_v60 = vadd.f32 %v479_v26, %v257_v15 }
 0x115   :  { %v303_v63 = vmax.f32 %v258_v60, 0.0 }
 0x11a   :  { %v260_v16 = vpop.f32.mrf.mxu1 }
 0x11b   :  { %v261_v58 = vadd.f32 %v479_v26, %v260_v16 }
 0x11d   :  { %v304_v61 = vmax.f32 %v261_v58, 0.0 }
 0x122   :  { %v263_v17 = vpop.f32.mrf.mxu1 }
 0x123   :  { %v264_v56 = vadd.f32 %v479_v26, %v263_v17 }
 0x125   :  { %v305_v59 = vmax.f32 %v264_v56, 0.0 }
 0x12a   :  { %v266_v20 = vpop.f32.mrf.mxu1 }
 0x12b   :  { %v267_v54 = vadd.f32 %v479_v26, %v266_v20 }
 0x12d   :  { %v306_v57 = vmax.f32 %v267_v54, 0.0 }
 0x132   :  { %v269_v22 = vpop.f32.mrf.mxu1 }
 0x133   :  { %v270_v52 = vadd.f32 %v479_v26, %v269_v22 }
 0x135   :  { %v307_v55 = vmax.f32 %v270_v52, 0.0  ;;  %v323_v2 = vpop.permute.xlu0 %322 }
 0x136   :  { %v325_v3 = vperm.slane %v323_v2, 0 }
 0x13a   :  { %v272_v24 = vpop.f32.mrf.mxu1 }
 0x13b   :  { %v273_v48 = vadd.f32 %v479_v26, %v272_v24 }
 0x13d   :  { %v308_v53 = vmax.f32 %v273_v48, 0.0 }
 0x142   :  { %v275_v27 = vpop.f32.mrf.mxu1 }
 0x143   :  { %v276_v46 = vadd.f32 %v479_v26, %v275_v27 }
 0x145   :  { %v309_v49 = vmax.f32 %v276_v46, 0.0 }
 0x14a   :  { %v278_v34 = vpop.f32.mrf.mxu1 }
 0x14b   :  { %v279_v44 = vadd.f32 %v479_v26, %v278_v34 }
 0x14d   :  { %v310_v47 = vmax.f32 %v279_v44, 0.0 }
 0x152   :  { %v281_v41 = vpop.f32.mrf.mxu1 }
 0x153   :  { %v282_v42 = vadd.f32 %v479_v26, %v281_v41 }
 0x155   :  { %v311_v45 = vmax.f32 %v282_v42, 0.0 }
 0x160   :  { %v284_v18 = vpop.f32.mrf.mxu3 }
 0x161   :  { %v285_v39 = vadd.f32 %v479_v26, %v284_v18 }
 0x163   :  { %v312_v43 = vmax.f32 %v285_v39, 0.0 }
 0x168   :  { %v287_v19 = vpop.f32.mrf.mxu3 }
 0x169   :  { %v288_v37 = vadd.f32 %v479_v26, %v287_v19 }
 0x16b   :  { %v313_v40 = vmax.f32 %v288_v37, 0.0 }
 0x170   :  { %v290_v21 = vpop.f32.mrf.mxu3 }
 0x171   :  { %v291_v35 = vadd.f32 %v479_v26, %v290_v21 }
 0x173   :  { %v314_v38 = vmax.f32 %v291_v35, 0.0 }
 0x178   :  { %v293_v23 = vpop.f32.mrf.mxu3 }
 0x179   :  { %v294_v32 = vadd.f32 %v479_v26, %v293_v23 }
 0x17b   :  { %v315_v36 = vmax.f32 %v294_v32, 0.0 }
 0x180   :  { %v296_v25 = vpop.f32.mrf.mxu3 }
 0x181   :  { %v297_v30 = vadd.f32 %v479_v26, %v296_v25 }
 0x183   :  { %v316_v33 = vmax.f32 %v297_v30, 0.0 }
 0x188   :  { %v299_v28 = vpop.f32.mrf.mxu3 }
 0x189   :  { %v300_v29 = vadd.f32 %v479_v26, %v299_v28 }
 0x18b   :  { %v317_v31 = vmax.f32 %v300_v29, 0.0 }
 0x18d   :  { %446 = vmatpush.xpose.msk.msra.mxu2 %vm188_vm1, %v317_v31 }
 0x191   :  { %447 = vmatpush.xpose.msk.msra.mxu2 %vm188_vm1, %v316_v33 }
 0x195   :  { %448 = vmatpush.xpose.msk.msra.mxu2 %vm188_vm1, %v315_v36 }
 0x199   :  { %449 = vmatpush.xpose.msk.msra.mxu2 %vm188_vm1, %v314_v38 }
 0x19d   :  { %450 = vmatpush.xpose.msk.msra.mxu2 %vm188_vm1, %v313_v40 }
 0x1a1   :  { %451 = vmatpush.xpose.msk.msra.mxu2 %vm188_vm1, %v312_v43 }
 0x1a5   :  { %452 = vmatpush.xpose.msk.msra.mxu2 %vm188_vm1, %v311_v45 }
 0x1a9   :  { %453 = vmatpush.xpose.msk.msra.mxu2 %vm188_vm1, %v310_v47 }
 0x1ad   :  { %454 = vmatpush.xpose.msk.msra.mxu2 %vm188_vm1, %v309_v49 }
 0x1b1   :  { %455 = vmatpush.xpose.msk.msra.mxu2 %vm188_vm1, %v308_v53 }
 0x1b5   :  { %456 = vmatpush.xpose.msk.msra.mxu2 %vm188_vm1, %v307_v55 }
 0x1b9   :  { %457 = vmatpush.xpose.msk.msra.mxu2 %vm188_vm1, %v306_v57 }
 0x1bd   :  { %458 = vmatpush.xpose.msk.msra.mxu2 %vm188_vm1, %v305_v59 }
 0x1c1   :  { %459 = vmatpush.xpose.msk.msra.mxu2 %vm188_vm1, %v304_v61 }
 0x1c5   :  { %460 = vmatpush.xpose.msk.msra.mxu2 %vm188_vm1, %v303_v63 }
 0x1c9   :  { %461 = vmatpush.xpose.msk.msra.mxu2 %vm188_vm1, %v302_v0 }
 0x1cc   :  { %462 = vmatmul.msk.f32.vlgmr.msra.gmra.mxu2 %vm188_vm1, %v318_v1 }
 0x24f   :  { %v394_v4 = vpop.f32.mrf.mxu2 }
 0x250   :  { %v395_v5 = vadd.f32 %v394_v4, %v325_v3 }
 0x252   :  { %397 = vst [vmem:[#allocation3] sm:$0x1] %v395_v5 }
 0x253   :  { %408 = dma.vmem_to_hbm [thread:$0]  %s404_s30, 16, %s406_s9, [#allocation4]  }
 0x254   :  { %504 = dma.done.wait [#allocation4], 16  }
 0x255   :  { %505 = vsyncadd [#allocation4], 4294967280 }
 0x256   :  { %413 = vsyncpa [#allocation4], 1 }

</bundles_post_ra>
